<compile_context>
chip_gen: v7x
topology: tpu7x:2x2x1
jax: 0.10.0
libtpu: 0.0.40
codegen_flags: <defaults>
</compile_context>

<pallas_src>
import functools

import jax
import jax.numpy as jnp
from jax.experimental import pallas as pl
from jax.experimental.pallas import tpu as pltpu


def _pixel_unshuffle_kernel(p_ref, x_ref, o_ref, *, k, h, w, wb, c_tile,
                            acc_dtype):
    """One (batch, channel-tile) grid step.

    p_ref: (K, K*WB, WB)       one-hot column de-interleave blocks (resident)
    x_ref: (C_TILE*K*H, K*W)   channel dim folded into sublanes in the wrapper
    o_ref: (C_TILE, K*K*H, W)  (K*K, H) collapsed into one sublane axis
    """
    n_wblk = w // wb
    for y in range(k):
        # All rows h*K + y of every channel in the tile: sublane-strided load,
        # pure data movement (no MXU, no dtype up-cast of the tile).
        # TODO(synk): for packed sub-32-bit dtypes a stride-K sublane slice may
        # lower to unpack/shuffle work; audit bundle dump if bf16/int8 matters.
        rows = x_ref[pl.ds(y, c_tile * h, stride=k), :]          # (C_TILE*H, K*W)
        for xx in range(k):
            p_xx = p_ref[xx]                                     # (K*WB, WB)
            for wi in range(n_wblk):
                if n_wblk == 1:
                    blk = rows                                   # (C_TILE*H, K*WB)
                else:
                    blk = rows[:, wi * wb * k:(wi + 1) * wb * k]
                # One-hot contraction => bit-exact in any accumulate dtype.
                res = jnp.dot(blk, p_xx, preferred_element_type=acc_dtype)
                res = res.astype(o_ref.dtype).reshape(c_tile, h, wb)
                if n_wblk == 1:
                    o_ref[:, pl.ds((y * k + xx) * h, h), :] = res
                else:
                    o_ref[:, pl.ds((y * k + xx) * h, h),
                          pl.ds(wi * wb, wb)] = res


def _vmem_capacity_bytes():
    """Physical VMEM per TensorCore; conservative fallback if unavailable."""
    try:
        info = pltpu.get_tpu_info()
        cap = getattr(info, "vmem_capacity_bytes", None)
        if cap:
            return int(cap)
    except Exception:
        pass
    return 64 << 20  # v7x-sized fallback (safe everywhere)


def _choose_c_tile(b, c, k, h, w, itemsize, wb, budget):
    """Largest channel tile whose *live* working set (2x in + 2x out + 2x P +
    res temporaries) fits the per-generation budget, with a legal (dtype-aware
    sublane-aligned) input block and, when possible, >= 2 grid steps so both
    v7x TensorCores get work."""
    kh, kw = k * h, k * w
    sub = max(8, 8 * (4 // max(itemsize, 1)))   # 8 f32 / 16 bf16 / 32 int8
    pad = lambda a, m: -(-a // m) * m

    def live_bytes(d):
        in_t = pad(d * kh, sub) * pad(kw, 128) * itemsize
        out_t = d * pad(k * k * h, sub) * pad(w, 128) * itemsize
        p_t = k * pad(k * wb, sub) * pad(wb, 128) * itemsize
        res_t = pad(d * h, sub) * pad(wb, 128) * 4   # worst-case f32 temp
        return 2 * (in_t + out_t + p_t) + 2 * res_t

    divisors = [d for d in range(1, c + 1) if c % d == 0]
    # input block second-minor dim (d*kh) must be sublane-aligned or full.
    legal = [d for d in divisors if (d * kh) % sub == 0 or d == c]
    fitting = [d for d in legal if live_bytes(d) <= budget] or [min(legal)]
    multi = [d for d in fitting if b * (c // d) >= 2] or fitting
    pick = max(multi)
    return pick, live_bytes(pick)


def pixel_unshuffle(x, downscale_factor):
    k = int(downscale_factor)
    b, c, kh, kw = x.shape
    assert kh % k == 0 and kw % k == 0, "spatial dims must be divisible by K"
    h, w = kh // k, kw // k
    orig_dtype = x.dtype

    # TODO(synk): integer inputs take a float32 round-trip (exact for |x|<2**24);
    # a copy-only non-MXU path would preserve the full integer range.
    if not jnp.issubdtype(x.dtype, jnp.floating):
        x = x.astype(jnp.float32)
    # One-hot contraction is exact in any dtype; accumulate directly in the
    # output dtype for f32/bf16 (no f32 intermediates, no full-tile cast).
    acc_dtype = x.dtype if x.dtype in (jnp.float32, jnp.bfloat16) else jnp.float32

    # Lane block: exploit the block structure of the permutation when W is a
    # multiple of 128 (cuts matmul flops by W/128 and keeps every store a
    # full, 128-lane-aligned slab); otherwise one W-wide block.
    wb = 128 if (w % 128 == 0) else w

    itemsize = x.dtype.itemsize
    vmem_cap = _vmem_capacity_bytes()
    budget = min(32 << 20, max(8 << 20, vmem_cap // 4))   # ~16 MiB v7x, 32 MiB v5e/v6e
    c_tile, live = _choose_c_tile(b, c, k, h, w, itemsize, wb, budget)
    vmem_limit = int(min(vmem_cap, max(live + (4 << 20), 16 << 20)))

    # One-hot de-interleave blocks: p[xx, j*K + xx, j] = 1 (built once here).
    # Small (<= (K, 128K, 128)); double-buffered cost is accounted in budget.
    ii = jnp.arange(k * wb)[None, :, None]
    jj = jnp.arange(wb)[None, None, :]
    xs = jnp.arange(k)[:, None, None]
    p = (ii == jj * k + xs).astype(x.dtype)               # (K, K*WB, WB)

    # Free metadata reshapes: fold channels into rows on input; output keeps
    # (K*K, H) fused on the sublane axis and is split back afterwards.
    x_flat = x.reshape(b, c * kh, kw)

    kernel = functools.partial(_pixel_unshuffle_kernel, k=k, h=h, w=w, wb=wb,
                               c_tile=c_tile, acc_dtype=acc_dtype)
    out4 = pl.pallas_call(
        kernel,
        out_shape=jax.ShapeDtypeStruct((b, c, k * k * h, w), x.dtype),
        grid_spec=pltpu.PrefetchScalarGridSpec(
            num_scalar_prefetch=0,
            grid=(b, c // c_tile),
            in_specs=[
                pl.BlockSpec((k, k * wb, wb), lambda bi, ci: (0, 0, 0)),   # P
                pl.BlockSpec((pl.Squeezed(), c_tile * kh, kw),
                             lambda bi, ci: (bi, ci, 0)),
            ],
            out_specs=pl.BlockSpec((pl.Squeezed(), c_tile, k * k * h, w),
                                   lambda bi, ci: (bi, ci, 0, 0)),
        ),
        compiler_params=pltpu.CompilerParams(
            dimension_semantics=("parallel", "parallel"),
            vmem_limit_bytes=vmem_limit),
        cost_estimate=pl.CostEstimate(
            flops=2 * b * c * h * w * (k ** 3) * wb,      # real tiled flops
            transcendentals=0,
            bytes_accessed=(2 * x.size + int(p.size)) * itemsize),
    )(p, x_flat)

    out = out4.reshape(b, c * k * k, h, w)
    if out.dtype != orig_dtype:
        out = out.astype(orig_dtype)
    return out


if __name__ == "__main__":
    key = jax.random.PRNGKey(0)
    B, C, K = 2, 4, 2
    H, W = 8, 8                 # output spatial; input spatial is (K*H, K*W) = (16, 16)
    x = jax.random.normal(key, (B, C, K * H, K * W), dtype=jnp.float32)

    out = jax.block_until_ready(pixel_unshuffle(x, K))

    # Pure-JAX reference (identical semantics to the torch grouped-conv module).
    ref = (x.reshape(B, C, H, K, W, K)
            .transpose(0, 1, 3, 5, 2, 4)
            .reshape(B, C * K * K, H, W))

    assert out.shape == (B, C * K * K, H, W), out.shape
    assert out.dtype == x.dtype
    assert bool(jnp.all(out == ref)), float(jnp.max(jnp.abs(out - ref)))
    print("KERNEL_OK")
</pallas_src>

<mosaic_0001>
module attributes {stable_mosaic.version = 11 : i64} {
  func.func @_pixel_unshuffle_kernel(%arg0: i32, %arg1: i32, %arg2: memref<2x16x8xf32, #tpu.memory_space<vmem>>, %arg3: memref<1x64x16xf32, #tpu.memory_space<vmem>>, %arg4: memref<1x4x32x8xf32, #tpu.memory_space<vmem>>) attributes {dimension_semantics = [#tpu.dimension_semantics<parallel>, #tpu.dimension_semantics<parallel>], iteration_bounds = array<i64: 2, 1>, scalar_prefetch = 0 : i64, scratch_operands = 0 : i64, tpu.core_type = #tpu.core_type<tc>, window_params = [{pipeline_mode = #tpu.pipeline_mode<synchronous>, transform_indices = @transform_0, window_bounds = array<i64: 2, 16, 8>}, {transform_indices = @transform_1, window_bounds = array<i64: 1, 64, 16>}, {transform_indices = @transform_2, window_bounds = array<i64: 1, 4, 32, 8>}]} {
    %c0 = arith.constant 0 : index
    %c0_0 = arith.constant 0 : index
    %c0_1 = arith.constant 0 : index
    %0 = tpu.strided_load %arg3[%c0, %c0_0, %c0_1] {strides = array<i32: 1, 2, 1>} : memref<1x64x16xf32, #tpu.memory_space<vmem>>, vector<1x32x16xf32>
    %1 = vector.shape_cast %0 : vector<1x32x16xf32> to vector<32x16xf32>
    %c0_2 = arith.constant 0 : index
    %c0_3 = arith.constant 0 : index
    %c0_4 = arith.constant 0 : index
    %2 = vector.load %arg2[%c0_2, %c0_3, %c0_4] : memref<2x16x8xf32, #tpu.memory_space<vmem>>, vector<1x16x8xf32>
    %3 = vector.shape_cast %2 : vector<1x16x8xf32> to vector<16x8xf32>
    %cst = arith.constant dense<0.000000e+00> : vector<32x8xf32>
    %4 = tpu.matmul %1, %3, %cst {dimension_numbers = #tpu.dot_dimension_numbers<[1], [0], [0], [1], [0, 0, 1, 1], [], []>} : vector<32x16xf32>, vector<16x8xf32>, vector<32x8xf32> -> vector<32x8xf32>
    %5 = vector.shape_cast %4 : vector<32x8xf32> to vector<4x8x8xf32>
    %c0_5 = arith.constant 0 : index
    %c0_6 = arith.constant 0 : index
    %c0_7 = arith.constant 0 : index
    %c0_8 = arith.constant 0 : index
    %6 = vector.load %arg4[%c0_5, %c0_6, %c0_7, %c0_8] : memref<1x4x32x8xf32, #tpu.memory_space<vmem>>, vector<1x4x8x8xf32>
    %7 = vector.shape_cast %6 : vector<1x4x8x8xf32> to vector<4x8x8xf32>
    %8 = vector.shape_cast %5 : vector<4x8x8xf32> to vector<1x4x8x8xf32>
    tpu.vector_store %arg4[%c0_5, %c0_6, %c0_7, %c0_8], %8 {strides = array<i32>} : memref<1x4x32x8xf32, #tpu.memory_space<vmem>>, vector<1x4x8x8xf32>,
    %c1 = arith.constant 1 : index
    %c0_9 = arith.constant 0 : index
    %c0_10 = arith.constant 0 : index
    %9 = vector.load %arg2[%c1, %c0_9, %c0_10] : memref<2x16x8xf32, #tpu.memory_space<vmem>>, vector<1x16x8xf32>
    %10 = vector.shape_cast %9 : vector<1x16x8xf32> to vector<16x8xf32>
    %cst_11 = arith.constant dense<0.000000e+00> : vector<32x8xf32>
    %11 = tpu.matmul %1, %10, %cst_11 {dimension_numbers = #tpu.dot_dimension_numbers<[1], [0], [0], [1], [0, 0, 1, 1], [], []>} : vector<32x16xf32>, vector<16x8xf32>, vector<32x8xf32> -> vector<32x8xf32>
    %12 = vector.shape_cast %11 : vector<32x8xf32> to vector<4x8x8xf32>
    %c0_12 = arith.constant 0 : index
    %c0_13 = arith.constant 0 : index
    %c8 = arith.constant 8 : index
    %c0_14 = arith.constant 0 : index
    %13 = vector.load %arg4[%c0_12, %c0_13, %c8, %c0_14] : memref<1x4x32x8xf32, #tpu.memory_space<vmem>>, vector<1x4x8x8xf32>
    %14 = vector.shape_cast %13 : vector<1x4x8x8xf32> to vector<4x8x8xf32>
    %15 = vector.shape_cast %12 : vector<4x8x8xf32> to vector<1x4x8x8xf32>
    tpu.vector_store %arg4[%c0_12, %c0_13, %c8, %c0_14], %15 {strides = array<i32>} : memref<1x4x32x8xf32, #tpu.memory_space<vmem>>, vector<1x4x8x8xf32>,
    %c0_15 = arith.constant 0 : index
    %c1_16 = arith.constant 1 : index
    %c0_17 = arith.constant 0 : index
    %16 = tpu.strided_load %arg3[%c0_15, %c1_16, %c0_17] {strides = array<i32: 1, 2, 1>} : memref<1x64x16xf32, #tpu.memory_space<vmem>>, vector<1x32x16xf32>
    %17 = vector.shape_cast %16 : vector<1x32x16xf32> to vector<32x16xf32>
    %c0_18 = arith.constant 0 : index
    %c0_19 = arith.constant 0 : index
    %c0_20 = arith.constant 0 : index
    %18 = vector.load %arg2[%c0_18, %c0_19, %c0_20] : memref<2x16x8xf32, #tpu.memory_space<vmem>>, vector<1x16x8xf32>
    %19 = vector.shape_cast %18 : vector<1x16x8xf32> to vector<16x8xf32>
    %cst_21 = arith.constant dense<0.000000e+00> : vector<32x8xf32>
    %20 = tpu.matmul %17, %19, %cst_21 {dimension_numbers = #tpu.dot_dimension_numbers<[1], [0], [0], [1], [0, 0, 1, 1], [], []>} : vector<32x16xf32>, vector<16x8xf32>, vector<32x8xf32> -> vector<32x8xf32>
    %21 = vector.shape_cast %20 : vector<32x8xf32> to vector<4x8x8xf32>
    %c0_22 = arith.constant 0 : index
    %c0_23 = arith.constant 0 : index
    %c16 = arith.constant 16 : index
    %c0_24 = arith.constant 0 : index
    %22 = vector.load %arg4[%c0_22, %c0_23, %c16, %c0_24] : memref<1x4x32x8xf32, #tpu.memory_space<vmem>>, vector<1x4x8x8xf32>
    %23 = vector.shape_cast %22 : vector<1x4x8x8xf32> to vector<4x8x8xf32>
    %24 = vector.shape_cast %21 : vector<4x8x8xf32> to vector<1x4x8x8xf32>
    tpu.vector_store %arg4[%c0_22, %c0_23, %c16, %c0_24], %24 {strides = array<i32>} : memref<1x4x32x8xf32, #tpu.memory_space<vmem>>, vector<1x4x8x8xf32>,
    %c1_25 = arith.constant 1 : index
    %c0_26 = arith.constant 0 : index
    %c0_27 = arith.constant 0 : index
    %25 = vector.load %arg2[%c1_25, %c0_26, %c0_27] : memref<2x16x8xf32, #tpu.memory_space<vmem>>, vector<1x16x8xf32>
    %26 = vector.shape_cast %25 : vector<1x16x8xf32> to vector<16x8xf32>
    %cst_28 = arith.constant dense<0.000000e+00> : vector<32x8xf32>
    %27 = tpu.matmul %17, %26, %cst_28 {dimension_numbers = #tpu.dot_dimension_numbers<[1], [0], [0], [1], [0, 0, 1, 1], [], []>} : vector<32x16xf32>, vector<16x8xf32>, vector<32x8xf32> -> vector<32x8xf32>
    %28 = vector.shape_cast %27 : vector<32x8xf32> to vector<4x8x8xf32>
    %c0_29 = arith.constant 0 : index
    %c0_30 = arith.constant 0 : index
    %c24 = arith.constant 24 : index
    %c0_31 = arith.constant 0 : index
    %29 = vector.load %arg4[%c0_29, %c0_30, %c24, %c0_31] : memref<1x4x32x8xf32, #tpu.memory_space<vmem>>, vector<1x4x8x8xf32>
    %30 = vector.shape_cast %29 : vector<1x4x8x8xf32> to vector<4x8x8xf32>
    %31 = vector.shape_cast %28 : vector<4x8x8xf32> to vector<1x4x8x8xf32>
    tpu.vector_store %arg4[%c0_29, %c0_30, %c24, %c0_31], %31 {strides = array<i32>} : memref<1x4x32x8xf32, #tpu.memory_space<vmem>>, vector<1x4x8x8xf32>,
    return
  }
  func.func @transform_0(%arg0: i32, %arg1: i32) -> (i32, i32, i32) {
    %c0_i32 = arith.constant 0 : i32
    %c0_i32_0 = arith.constant 0 : i32
    %c0_i32_1 = arith.constant 0 : i32
    %c0_i32_2 = arith.constant 0 : i32
    return %c0_i32, %c0_i32_0, %c0_i32_1 : i32, i32, i32
  }
  func.func @transform_1(%arg0: i32, %arg1: i32) -> (i32, i32, i32) {
    %c0_i32 = arith.constant 0 : i32
    %c0_i32_0 = arith.constant 0 : i32
    return %arg0, %arg1, %c0_i32 : i32, i32, i32
  }
  func.func @transform_2(%arg0: i32, %arg1: i32) -> (i32, i32, i32, i32) {
    %c0_i32 = arith.constant 0 : i32
    %c0_i32_0 = arith.constant 0 : i32
    %c0_i32_1 = arith.constant 0 : i32
    return %arg0, %arg1, %c0_i32, %c0_i32_0 : i32, i32, i32, i32
  }
}

</mosaic_0001>

<bundles_post_ra>
// kernel: tpu_custom_call.1
= control target key start
LH: loop header
LB: loop body
LE: loop exit
PB: predicated region body
PF: predicated region fallthrough
CT: control target
= control target key end

     0   :  { %s867_s9 = smov 0   ;;  %s869_s10 = smov 0   ;;  %s966_s0 = inlined_call_operand.vmem [shape: f32[2,16,8], index: 0, kind: input, shape index: {}]   ;;  %s967_s1 = inlined_call_operand.vmem [shape: f32[2,64,16], index: 1, kind: input, shape index: {}]   ;;  %s968_s2 = inlined_call_operand.vmem [shape: f32[2,4,32,8], index: 2, kind: output, shape index: {}]  }
   0x1   :  { %s871_s11 = smov 0  }
   0x2 LB: > { %s24_s12 = sadd.s32 1, %s846_s10  ;;  %p688_p0 = scmp.ge.s32.totalorder %s850_s11, 1  ;;  %s850_s11 = sphi %s871_s11, %s12_s11   ;;  %s846_s10 = sphi %s869_s10, %s970_s10   ;;  %s842_s9 = sphi %s867_s9, %s969_s9  }
   0x3   : > { %p26_p1 = scmp.ge.s32.totalorder %s24_s12, 2  ;;  %p133_p2 = scmp.lt.s32.totalorder %s850_s11, 3 }
   0x5   : > { %s972_s12 = smov (%p26_p1, %s24_s12), 0  ;;  %p134_p3 = pnand %p688_p0, %p133_p2 }
   0x6   : > { %v192_v0 = vld [vmem:[%s966_s0] sm:$0xff] (!%p134_p3)  ;;  %v193_v1 = vld [vmem:[%s966_s0 + $0x8] sm:$0xff] (!%p134_p3)  ;;  %v700_v2 = vld [vmem:[%s966_s0 + $0x10] sm:$0xff] (!%p134_p3)  ;;  %p165_p4 = scmp.lt.s32.totalorder (!%p134_p3), %s842_s9, 1  ;;  %vm194_vm0 = vcmask (!%p134_p3), 130048   ;;  %vm292_vm1 = vcmask (!%p134_p3), 64512  }
   0x7   : > { %137 = sbr.rel (%p134_p3) target bundleno = 245 (0xf5), region = 28  ;;  %v788_v3 = vpack.c.bf16 (!%p134_p3), %v193_v1, %v192_v0  ;;  %v701_v4 = vld [vmem:[%s966_s0 + $0x18] sm:$0xff] (!%p134_p3) }
   0x8   : > { %v792_v5 = vpack.c.bf16 (!%p134_p3), %v701_v4, %v700_v2 }
   0x9   : > { %789 = vmatprep.subr.bf16.mxu0 (!%p134_p3), %v788_v3 }
   0xa   : > { %793 = vmatprep.subr.bf16.mxu1 (!%p134_p3), %v792_v5  ;;  %791 = vmatpush3.bf16.msra.mxu0 (!%p134_p3), %v788_v3 }
   0xb   : > { %795 = vmatpush3.bf16.msra.mxu1 (!%p134_p3), %v792_v5  ;;  %797 = vmatprep.subr.bf16.mxu0 (!%p134_p3), %v788_v3 }
   0xc   : > { %801 = vmatprep.subr.bf16.mxu1 (!%p134_p3), %v792_v5 }
   0xe   : > { %s974_s9 = smov (!%p165_p4, %s842_s9), 1 }
   0xf   : > { %s722_s21 = sshll.u32 %s974_s9, 6  ;;  %s723_s25 = sshll.u32 %s974_s9, 7 }
  0x10   : > { %s172_s24 = scalar_lea.vmem %s967_s1, %s722_s21  ;;  %s923_s28 = scalar_lea.vmem %s968_s2, %s723_s25 }
  0x11   : > { %v185_v6 = vld [vmem:[%s172_s24] ss:$2 sm:$0xff]  ;;  %v693_v7 = vld [vmem:[%s172_s24 + $0x10] ss:$2 sm:$0xff]  ;;  %v706_v10 = vld [vmem:[%s172_s24 + $0x1] ss:$2 sm:$0xff] }
  0x12   : > { %752 = vmatprep.mubr.msk.f32.mxu0 %vm194_vm0, %v185_v6  ;;  %762 = vmatprep.mubr.msk.f32.mxu1 %vm194_vm0, %v185_v6  ;;  %v694_v8 = vld [vmem:[%s172_s24 + $0x20] ss:$2 sm:$0xff]  ;;  %v695_v9 = vld [vmem:[%s172_s24 + $0x30] ss:$2 sm:$0xff]  ;;  %v707_v11 = vld [vmem:[%s172_s24 + $0x11] ss:$2 sm:$0xff] }
  0x13   : > { %753 = vmatmul.mubr.msk.f32.vlgmr.msra.gmra.mrb[0].mxu0 %vm194_vm0, %v693_v7  ;;  %763 = vmatmul.mubr.msk.f32.vlgmr.msra.gmra.mrb[0].mxu1 %vm194_vm0, %v693_v7  ;;  %v708_v12 = vld [vmem:[%s172_s24 + $0x21] ss:$2 sm:$0xff]  ;;  %v709_v13 = vld [vmem:[%s172_s24 + $0x31] ss:$2 sm:$0xff] }
  0x14   : > { %799 = vmatpush3.bf16.msra.mxu0 %v788_v3  ;;  %803 = vmatpush3.bf16.msra.mxu1 %v792_v5 }
  0x15   : > { %755 = vmatprep.mubr.msk.f32.mxu0 %vm194_vm0, %v694_v8  ;;  %765 = vmatprep.mubr.msk.f32.mxu1 %vm194_vm0, %v694_v8 }
  0x17   : > { %756 = vmatmul.mubr.msk.f32.gmra.mrb[2].mxu0 %vm194_vm0, %v695_v9  ;;  %766 = vmatmul.mubr.msk.f32.gmra.mrb[2].mxu1 %vm194_vm0, %v695_v9 }
  0x18   : > { %772 = vmatprep.mubr.msk.f32.mxu0 %vm194_vm0, %v706_v10  ;;  %782 = vmatprep.mubr.msk.f32.mxu1 %vm194_vm0, %v706_v10 }
  0x1b   : > { %773 = vmatmul.mubr.msk.f32.vlgmr.msra.gmra.mrb[4].mxu0 %vm194_vm0, %v707_v11  ;;  %783 = vmatmul.mubr.msk.f32.vlgmr.msra.gmra.mrb[4].mxu1 %vm194_vm0, %v707_v11 }
  0x1c   : > { %775 = vmatprep.mubr.msk.f32.mxu0 %vm194_vm0, %v708_v12  ;;  %785 = vmatprep.mubr.msk.f32.mxu1 %vm194_vm0, %v708_v12 }
  0x1f   : > { %776 = vmatmul.mubr.msk.f32.gmra.mrb[6].mxu0 %vm194_vm0, %v709_v13  ;;  %786 = vmatmul.mubr.msk.f32.gmra.mrb[6].mxu1 %vm194_vm0, %v709_v13 }
  0xe6   : > { %v754_v14 = vpop.f32.mrb[0].mxu0  ;;  %v764_v15 = vpop.f32.mrb[0].mxu1 }
  0xe7   : > { %294 = vst.msk [vmem:[%s923_s28 + $0x20] sm:$0xff] %vm292_vm1, %v754_v14  ;;  %386 = vst.msk [vmem:[%s923_s28 + $0x28] sm:$0xff] %vm292_vm1, %v764_v15  ;;  %v273_v16 = vpop.f32.mrb[1].mxu0  ;;  %v366_v17 = vpop.f32.mrb[1].mxu1 }
  0xe8   : > { %293 = vst.msk [vmem:[%s923_s28] sm:$0xff] %vm292_vm1, %v273_v16  ;;  %385 = vst.msk [vmem:[%s923_s28 + $0x8] sm:$0xff] %vm292_vm1, %v366_v17 }
  0xea   : > { %v757_v18 = vpop.f32.mrb[2].mxu0  ;;  %v767_v19 = vpop.f32.mrb[2].mxu1 }
  0xeb   : > { %296 = vst.msk [vmem:[%s923_s28 + $0x60] sm:$0xff] %vm292_vm1, %v757_v18  ;;  %388 = vst.msk [vmem:[%s923_s28 + $0x68] sm:$0xff] %vm292_vm1, %v767_v19  ;;  %v283_v20 = vpop.f32.mrb[3].mxu0  ;;  %v376_v21 = vpop.f32.mrb[3].mxu1 }
  0xec   : > { %295 = vst.msk [vmem:[%s923_s28 + $0x40] sm:$0xff] %vm292_vm1, %v283_v20  ;;  %387 = vst.msk [vmem:[%s923_s28 + $0x48] sm:$0xff] %vm292_vm1, %v376_v21 }
  0xee   : > { %v774_v22 = vpop.f32.mrb[4].mxu0  ;;  %v784_v23 = vpop.f32.mrb[4].mxu1 }
  0xef   : > { %497 = vst.msk [vmem:[%s923_s28 + $0x30] sm:$0xff] %vm292_vm1, %v774_v22  ;;  %588 = vst.msk [vmem:[%s923_s28 + $0x38] sm:$0xff] %vm292_vm1, %v784_v23  ;;  %v477_v24 = vpop.f32.mrb[5].mxu0  ;;  %v568_v25 = vpop.f32.mrb[5].mxu1 }
  0xf0   : > { %496 = vst.msk [vmem:[%s923_s28 + $0x10] sm:$0xff] %vm292_vm1, %v477_v24  ;;  %587 = vst.msk [vmem:[%s923_s28 + $0x18] sm:$0xff] %vm292_vm1, %v568_v25 }
  0xf2   : > { %v777_v26 = vpop.f32.mrb[6].mxu0  ;;  %v787_v27 = vpop.f32.mrb[6].mxu1 }
  0xf3   : > { %499 = vst.msk [vmem:[%s923_s28 + $0x70] sm:$0xff] %vm292_vm1, %v777_v26  ;;  %590 = vst.msk [vmem:[%s923_s28 + $0x78] sm:$0xff] %vm292_vm1, %v787_v27  ;;  %v487_v28 = vpop.f32.mrb[7].mxu0  ;;  %v578_v29 = vpop.f32.mrb[7].mxu1 }
  0xf4   : > { %498 = vst.msk [vmem:[%s923_s28 + $0x50] sm:$0xff] %vm292_vm1, %v487_v28  ;;  %589 = vst.msk [vmem:[%s923_s28 + $0x58] sm:$0xff] %vm292_vm1, %v578_v29 }
  0xf5 PF: > { %s12_s11 = sadd.s32 1, %s850_s11   ;;  %s969_s9 = smov %s846_s10 }
  0xf6   : > { %p9_p5 = scmp.ge.s32.totalorder %s12_s11, 4   ;;  %s970_s10 = smov %s972_s12 }
  0xf8   :  { %11 = sbr.rel (!%p9_p5) target bundleno = 2 (0x2), region = 66 }

</bundles_post_ra>
